<compile_context>
chip_gen: v5e
topology: v5e:2x2
jax: 0.10.0
libtpu: 0.0.40
codegen_flags: <defaults>
</compile_context>

<pallas_src>
import jax
import jax.numpy as jnp
from jax.experimental import pallas as pl
from jax.experimental.pallas import tpu as pltpu


# ----------------------------------------------------------------------------
# Kernels
# ----------------------------------------------------------------------------

def _fcc_bottleneck_kernel(x_ref, w1_ref, bias_ref, w2_ref, o_ref):
    # Resident-weight path.
    # x:    (TM, C)   activation dtype (f32 or bf16)
    # w1:   (C, Hp)   bf16, BN scale folded in (Hp = H padded to 128)
    # bias: (1, Hp)   f32 folded BN bias (beta - mean * scale; zero in pad)
    # w2:   (Hp, C)   bf16 (zero rows in pad)
    x = x_ref[...]
    h = jnp.dot(x.astype(w1_ref.dtype), w1_ref[...],
                preferred_element_type=jnp.float32)
    h = jnp.maximum(h + bias_ref[...], 0.0)          # f32 epilogue on the acc
    y = jnp.dot(h.astype(w2_ref.dtype), w2_ref[...],
                preferred_element_type=jnp.float32)
    o_ref[...] = (x.astype(jnp.float32) + y).astype(o_ref.dtype)


def _fcc_bottleneck_split_kernel(x_ref, w1_ref, bias_ref, w2_ref, o_ref, h_ref):
    # Large-C path: w2 / output tiled along output channels (grid axis j).
    # x:    (TM, C)    resident across j
    # w1:   (C, Hp)    resident
    # bias: (1, Hp)    resident
    # w2:   (Hp, TC)   j-th output-channel slab
    # o:    (TM, TC)
    # h:    (TM, Hp)   f32 scratch, computed once per batch tile (j == 0)
    j = pl.program_id(1)
    tc = o_ref.shape[-1]

    @pl.when(j == 0)
    def _():
        h = jnp.dot(x_ref[...].astype(w1_ref.dtype), w1_ref[...],
                    preferred_element_type=jnp.float32)
        h_ref[...] = jnp.maximum(h + bias_ref[...], 0.0)

    y = jnp.dot(h_ref[...].astype(w2_ref.dtype), w2_ref[...],
                preferred_element_type=jnp.float32)
    start = pl.multiple_of(j * tc, 128)               # tc is a 128-multiple
    x_slab = x_ref[:, pl.ds(start, tc)]
    o_ref[...] = (x_slab.astype(jnp.float32) + y).astype(o_ref.dtype)


# ----------------------------------------------------------------------------
# Parameter preparation (run ONCE, outside the per-call path)
# ----------------------------------------------------------------------------

def prepare_fcc_bottleneck_params(w1, gamma, beta, running_mean, running_var,
                                  w2, eps=1e-5, param_dtype=jnp.bfloat16,
                                  lane_multiple=128):
    """w1: (H, C) torch layout, w2: (C, H) torch layout.

    Returns (w1_t, bias2d, w2_t):
      w1_t  : (C, Hp) bf16, BN scale folded in, H zero-padded to lane_multiple
      bias2d: (1, Hp) f32 folded BN bias (zero in the padded region)
      w2_t  : (Hp, C) bf16 (zero padded rows)
    """
    H, C = w1.shape
    assert w2.shape == (C, H)
    scale = gamma / jnp.sqrt(running_var + eps)           # (H,)
    bias = beta - running_mean * scale                    # (H,)
    w1_t = jnp.transpose(w1 * scale[:, None])             # (C, H)
    w2_t = jnp.transpose(w2)                              # (H, C)
    hp = _round_up(H, lane_multiple)
    if hp != H:
        pad = hp - H
        w1_t = jnp.pad(w1_t, ((0, 0), (0, pad)))
        w2_t = jnp.pad(w2_t, ((0, pad), (0, 0)))
        bias = jnp.pad(bias, (0, pad))
    return (w1_t.astype(param_dtype),
            bias.reshape(1, hp).astype(jnp.float32),
            w2_t.astype(param_dtype))


# ----------------------------------------------------------------------------
# Tiling / VMEM budgeting helpers
# ----------------------------------------------------------------------------

def _round_up(x, m):
    return (x + m - 1) // m * m


def _vmem_capacity_bytes():
    try:
        info = pltpu.get_tpu_info()
        for name in ("vmem_capacity_bytes", "vmem_size_bytes", "vmem_bytes"):
            v = getattr(info, name, None)
            if v:
                return int(v)
    except Exception:
        pass
    return 64 << 20  # conservative per-TensorCore default (v7x)


def _vmem_needed(tm, C, Hp, tc, act_bytes, w_bytes):
    """Rough (conservative) VMEM footprint for the chosen tiling."""
    if tc:
        x_tiles = 2 * tm * C * act_bytes               # double-buffered
        out_tiles = 2 * tm * tc * act_bytes
        weights = C * Hp * w_bytes + 2 * Hp * tc * w_bytes + Hp * 4
        scratch = tm * Hp * 4
    else:
        x_tiles = 2 * tm * C * act_bytes
        out_tiles = 2 * tm * C * act_bytes
        weights = 2 * C * Hp * w_bytes + Hp * 4        # single-buffered target
        scratch = 0
    interm = tm * Hp * 4 + tm * (tc or C) * 4          # f32 temporaries
    return x_tiles + out_tiles + weights + scratch + interm


def _pick_tc(C):
    for cand in (1024, 512, 256, 128):
        if C % cand == 0:
            return cand
    return 0


def _select_tm(B, C, Hp, tc, act_bytes, w_bytes, budget, max_tm):
    tm = 8
    for cand in (1024, 512, 256, 128, 64, 32, 16, 8):
        if cand > max_tm:
            continue
        if _vmem_needed(cand, C, Hp, tc, act_bytes, w_bytes) <= budget:
            tm = cand
            break
    if B <= tm:
        tm = B          # full-batch block (always a legal block shape)
    # v7x megacore: give the 'parallel' batch axis >= 2 steps to shard across
    # the two TensorCores (costs ~nothing on single-TC v5e / v6e).
    if B > 256 and pl.cdiv(B, tm) < 2:
        tm = _round_up(pl.cdiv(B, 2), 8)
    return tm


# ----------------------------------------------------------------------------
# Wrapper
# ----------------------------------------------------------------------------

def _build_and_call(x, w1_t, bias2d, w2_t, *, tm, tc, vmem_limit, cost,
                    single_buffer_weights):
    B, C = x.shape
    _, Hp = w1_t.shape
    out_shape = jax.ShapeDtypeStruct((B, C), x.dtype)
    # Resident operands never change block -> 1 buffer is enough (VMEM saver).
    wk = dict(pipeline_mode=pl.Buffered(1)) if single_buffer_weights else {}

    if tc == 0:
        grid = (pl.cdiv(B, tm),)
        in_specs = [
            pl.BlockSpec((tm, C), lambda i: (i, 0)),          # x: batch-tiled
            pl.BlockSpec((C, Hp), lambda i: (0, 0), **wk),    # w1: resident
            pl.BlockSpec((1, Hp), lambda i: (0, 0), **wk),    # bias: resident
            pl.BlockSpec((Hp, C), lambda i: (0, 0), **wk),    # w2: resident
        ]
        out_specs = pl.BlockSpec((tm, C), lambda i: (i, 0))
        scratch_shapes = []
        kernel = _fcc_bottleneck_kernel
        dims = ("parallel",)
    else:
        grid = (pl.cdiv(B, tm), C // tc)
        in_specs = [
            pl.BlockSpec((tm, C), lambda i, j: (i, 0)),       # x: resident over j
            pl.BlockSpec((C, Hp), lambda i, j: (0, 0), **wk),
            pl.BlockSpec((1, Hp), lambda i, j: (0, 0), **wk),
            pl.BlockSpec((Hp, tc), lambda i, j: (0, j)),      # w2: streamed slabs
        ]
        out_specs = pl.BlockSpec((tm, tc), lambda i, j: (i, j))
        scratch_shapes = [pltpu.VMEM((tm, Hp), jnp.float32)]
        kernel = _fcc_bottleneck_split_kernel
        dims = ("parallel", "arbitrary")

    return pl.pallas_call(
        kernel,
        out_shape=out_shape,
        grid_spec=pltpu.PrefetchScalarGridSpec(
            num_scalar_prefetch=0,
            grid=grid,
            in_specs=in_specs,
            out_specs=out_specs,
            scratch_shapes=scratch_shapes),
        compiler_params=pltpu.CompilerParams(
            dimension_semantics=dims,
            vmem_limit_bytes=vmem_limit),
        cost_estimate=cost,
    )(x, w1_t, bias2d, w2_t)


def fcc_bottleneck(x, w1_t, bias2d, w2_t, *, tc=None, max_tm=1024):
    """x: (B, C) activations (f32 or bf16); params from
    prepare_fcc_bottleneck_params.  tc=None -> auto (tile w2's output-C only
    when the resident weights would crowd VMEM); tc=0 forces the resident
    path; tc=k (multiple of 128 dividing C) forces the split path."""
    B, C = x.shape
    Cw, Hp = w1_t.shape
    assert Cw == C and w2_t.shape == (Hp, C) and bias2d.shape == (1, Hp)

    act_bytes = x.dtype.itemsize
    w_bytes = w1_t.dtype.itemsize
    cap = _vmem_capacity_bytes()
    budget = max(cap - (16 << 20), 8 << 20)     # leave headroom for the compiler

    if tc is None:
        weight_bytes = 2 * C * Hp * w_bytes + Hp * 4
        tc = _pick_tc(C) if weight_bytes > budget // 3 else 0
    if tc:
        assert C % tc == 0 and tc % 128 == 0, "tc must be a 128-multiple dividing C"

    tm = _select_tm(B, C, Hp, tc, act_bytes, w_bytes, budget, max_tm)

    needed = _vmem_needed(tm, C, Hp, tc, act_bytes, w_bytes)
    vmem_limit = int(min(max(needed + (8 << 20), 32 << 20), int(cap * 0.95)))

    flops = 4 * B * C * Hp
    bytes_accessed = (2 * B * C * act_bytes                      # x read + out write
                      + 2 * C * Hp * w_bytes + Hp * 4)           # weights + bias
    cost = pl.CostEstimate(flops=int(flops), transcendentals=0,
                           bytes_accessed=int(bytes_accessed))

    try:
        return _build_and_call(x, w1_t, bias2d, w2_t, tm=tm, tc=tc,
                               vmem_limit=vmem_limit, cost=cost,
                               single_buffer_weights=True)
    except Exception:
        # pipeline_mode=pl.Buffered(1) unsupported on this jax version:
        # fall back to default double-buffered resident weights.
        return _build_and_call(x, w1_t, bias2d, w2_t, tm=tm, tc=tc,
                               vmem_limit=vmem_limit, cost=cost,
                               single_buffer_weights=False)


def fcc_bottleneck_ref(x, w1, gamma, beta, running_mean, running_var, w2,
                       eps=1e-5):
    """Pure-JAX f32 reference (eval-mode BatchNorm)."""
    h = x @ w1.T
    h = (h - running_mean) / jnp.sqrt(running_var + eps) * gamma + beta
    h = jnp.maximum(h, 0.0)
    return x + h @ w2.T


# ----------------------------------------------------------------------------
# Demo / self-test
# ----------------------------------------------------------------------------

if __name__ == "__main__":
    def make_case(key, B, C, reduce_factor):
        H = C // reduce_factor
        ks = jax.random.split(key, 7)
        x = jax.random.normal(ks[0], (B, C), dtype=jnp.float32)
        w1 = jax.random.normal(ks[1], (H, C), dtype=jnp.float32) * 0.05
        w2 = jax.random.normal(ks[2], (C, H), dtype=jnp.float32) * 0.05
        gamma = 1.0 + 0.1 * jax.random.normal(ks[3], (H,), dtype=jnp.float32)
        beta = 0.1 * jax.random.normal(ks[4], (H,), dtype=jnp.float32)
        mean = 0.1 * jax.random.normal(ks[5], (H,), dtype=jnp.float32)
        var = jnp.abs(1.0 + 0.1 * jax.random.normal(ks[6], (H,),
                                                    dtype=jnp.float32))
        return x, w1, gamma, beta, mean, var, w2

    key = jax.random.PRNGKey(0)
    k1, k2 = jax.random.split(key)

    # Case 1: resident-weight path (C=128, H=32 zero-padded to 128).
    x, w1, g, b, m, v, w2 = make_case(k1, B=8, C=128, reduce_factor=4)
    params = jax.block_until_ready(
        prepare_fcc_bottleneck_params(w1, g, b, m, v, w2))
    out = jax.block_until_ready(fcc_bottleneck(x, *params))
    ref = fcc_bottleneck_ref(x, w1, g, b, m, v, w2)
    assert out.shape == x.shape
    assert jnp.allclose(out, ref, atol=5e-2, rtol=5e-2), (
        float(jnp.max(jnp.abs(out - ref))))

    # Case 2: split-C path (w2 tiled along output channels), forced via tc=128.
    x, w1, g, b, m, v, w2 = make_case(k2, B=32, C=256, reduce_factor=4)
    params = jax.block_until_ready(
        prepare_fcc_bottleneck_params(w1, g, b, m, v, w2))
    out = jax.block_until_ready(fcc_bottleneck(x, *params, tc=128))
    ref = fcc_bottleneck_ref(x, w1, g, b, m, v, w2)
    assert out.shape == x.shape
    assert jnp.allclose(out, ref, atol=5e-2, rtol=5e-2), (
        float(jnp.max(jnp.abs(out - ref))))

    print("KERNEL_OK")
</pallas_src>

<mosaic_0001>
module attributes {stable_mosaic.version = 11 : i64} {
  func.func @_fcc_bottleneck_kernel(%arg0: i32, %arg1: memref<8x128xf32, #tpu.memory_space<vmem>>, %arg2: memref<128x128xbf16, #tpu.memory_space<vmem>>, %arg3: memref<1x128xf32, #tpu.memory_space<vmem>>, %arg4: memref<128x128xbf16, #tpu.memory_space<vmem>>, %arg5: memref<8x128xf32, #tpu.memory_space<vmem>>) attributes {dimension_semantics = [#tpu.dimension_semantics<parallel>], iteration_bounds = array<i64: 1>, scalar_prefetch = 0 : i64, scratch_operands = 0 : i64, tpu.core_type = #tpu.core_type<tc>, window_params = [{transform_indices = @transform_0, window_bounds = array<i64: 8, 128>}, {pipeline_mode = #tpu.pipeline_mode<synchronous>, transform_indices = @transform_1, window_bounds = array<i64: 128, 128>}, {pipeline_mode = #tpu.pipeline_mode<synchronous>, transform_indices = @transform_2, window_bounds = array<i64: 1, 128>}, {pipeline_mode = #tpu.pipeline_mode<synchronous>, transform_indices = @transform_3, window_bounds = array<i64: 128, 128>}, {transform_indices = @transform_4, window_bounds = array<i64: 8, 128>}]} {
    %c0 = arith.constant 0 : index
    %c0_0 = arith.constant 0 : index
    %0 = vector.load %arg1[%c0, %c0_0] : memref<8x128xf32, #tpu.memory_space<vmem>>, vector<8x128xf32>
    %1 = arith.truncf %0 : vector<8x128xf32> to vector<8x128xbf16>
    %c0_1 = arith.constant 0 : index
    %c0_2 = arith.constant 0 : index
    %2 = vector.load %arg2[%c0_1, %c0_2] : memref<128x128xbf16, #tpu.memory_space<vmem>>, vector<128x128xbf16>
    %cst = arith.constant dense<0.000000e+00> : vector<8x128xf32>
    %3 = tpu.matmul %1, %2, %cst {dimension_numbers = #tpu.dot_dimension_numbers<[1], [0], [0], [1], [0, 0, 1, 1], [], []>} : vector<8x128xbf16>, vector<128x128xbf16>, vector<8x128xf32> -> vector<8x128xf32>
    %c0_3 = arith.constant 0 : index
    %c0_4 = arith.constant 0 : index
    %4 = vector.load %arg3[%c0_3, %c0_4] : memref<1x128xf32, #tpu.memory_space<vmem>>, vector<1x128xf32>
    %5 = vector.broadcast %4 : vector<1x128xf32> to vector<8x128xf32>
    %6 = arith.addf %3, %5 : vector<8x128xf32>
    %cst_5 = arith.constant 0.000000e+00 : f32
    %7 = vector.broadcast %cst_5 : f32 to vector<8x128xf32>
    %8 = arith.maximumf %6, %7 : vector<8x128xf32>
    %9 = arith.truncf %8 : vector<8x128xf32> to vector<8x128xbf16>
    %c0_6 = arith.constant 0 : index
    %c0_7 = arith.constant 0 : index
    %10 = vector.load %arg4[%c0_6, %c0_7] : memref<128x128xbf16, #tpu.memory_space<vmem>>, vector<128x128xbf16>
    %cst_8 = arith.constant dense<0.000000e+00> : vector<8x128xf32>
    %11 = tpu.matmul %9, %10, %cst_8 {dimension_numbers = #tpu.dot_dimension_numbers<[1], [0], [0], [1], [0, 0, 1, 1], [], []>} : vector<8x128xbf16>, vector<128x128xbf16>, vector<8x128xf32> -> vector<8x128xf32>
    %12 = arith.addf %0, %11 : vector<8x128xf32>
    %c0_9 = arith.constant 0 : index
    %c0_10 = arith.constant 0 : index
    %13 = vector.load %arg5[%c0_9, %c0_10] : memref<8x128xf32, #tpu.memory_space<vmem>>, vector<8x128xf32>
    tpu.vector_store %arg5[%c0_9, %c0_10], %12 {strides = array<i32>} : memref<8x128xf32, #tpu.memory_space<vmem>>, vector<8x128xf32>,
    return
  }
  func.func @transform_0(%arg0: i32) -> (i32, i32) {
    %c0_i32 = arith.constant 0 : i32
    %c0_i32_0 = arith.constant 0 : i32
    return %arg0, %c0_i32 : i32, i32
  }
  func.func @transform_1(%arg0: i32) -> (i32, i32) {
    %c0_i32 = arith.constant 0 : i32
    %c0_i32_0 = arith.constant 0 : i32
    %c0_i32_1 = arith.constant 0 : i32
    return %c0_i32, %c0_i32_0 : i32, i32
  }
  func.func @transform_2(%arg0: i32) -> (i32, i32) {
    %c0_i32 = arith.constant 0 : i32
    %c0_i32_0 = arith.constant 0 : i32
    %c0_i32_1 = arith.constant 0 : i32
    return %c0_i32, %c0_i32_0 : i32, i32
  }
  func.func @transform_3(%arg0: i32) -> (i32, i32) {
    %c0_i32 = arith.constant 0 : i32
    %c0_i32_0 = arith.constant 0 : i32
    %c0_i32_1 = arith.constant 0 : i32
    return %c0_i32, %c0_i32_0 : i32, i32
  }
  func.func @transform_4(%arg0: i32) -> (i32, i32) {
    %c0_i32 = arith.constant 0 : i32
    %c0_i32_0 = arith.constant 0 : i32
    return %arg0, %c0_i32 : i32, i32
  }
}

module attributes {stable_mosaic.version = 11 : i64} {
  func.func @_fcc_bottleneck_kernel(%arg0: i32, %arg1: memref<8x128xf32, #tpu.memory_space<vmem>>, %arg2: memref<128x128xbf16, #tpu.memory_space<vmem>>, %arg3: memref<1x128xf32, #tpu.memory_space<vmem>>, %arg4: memref<128x128xbf16, #tpu.memory_space<vmem>>, %arg5: memref<8x128xf32, #tpu.memory_space<vmem>>) attributes {dimension_semantics = [#tpu.dimension_semantics<parallel>], iteration_bounds = array<i64: 1>, scalar_prefetch = 0 : i64, scratch_operands = 0 : i64, tpu.core_type = #tpu.core_type<tc>, window_params = [{transform_indices = @transform_0, window_bounds = array<i64: 8, 128>}, {pipeline_mode = #tpu.pipeline_mode<synchronous>, transform_indices = @transform_1, window_bounds = array<i64: 128, 128>}, {pipeline_mode = #tpu.pipeline_mode<synchronous>, transform_indices = @transform_2, window_bounds = array<i64: 1, 128>}, {pipeline_mode = #tpu.pipeline_mode<synchronous>, transform_indices = @transform_3, window_bounds = array<i64: 128, 128>}, {transform_indices = @transform_4, window_bounds = array<i64: 8, 128>}]} {
    %c0 = arith.constant 0 : index
    %c0_0 = arith.constant 0 : index
    %0 = vector.load %arg1[%c0, %c0_0] : memref<8x128xf32, #tpu.memory_space<vmem>>, vector<8x128xf32>
    %1 = arith.truncf %0 : vector<8x128xf32> to vector<8x128xbf16>
    %c0_1 = arith.constant 0 : index
    %c0_2 = arith.constant 0 : index
    %2 = vector.load %arg2[%c0_1, %c0_2] : memref<128x128xbf16, #tpu.memory_space<vmem>>, vector<128x128xbf16>
    %cst = arith.constant dense<0.000000e+00> : vector<8x128xf32>
    %3 = tpu.matmul %1, %2, %cst {dimension_numbers = #tpu.dot_dimension_numbers<[1], [0], [0], [1], [0, 0, 1, 1], [], []>} : vector<8x128xbf16>, vector<128x128xbf16>, vector<8x128xf32> -> vector<8x128xf32>
    %c0_3 = arith.constant 0 : index
    %c0_4 = arith.constant 0 : index
    %4 = vector.load %arg3[%c0_3, %c0_4] : memref<1x128xf32, #tpu.memory_space<vmem>>, vector<1x128xf32>
    %5 = vector.broadcast %4 : vector<1x128xf32> to vector<8x128xf32>
    %6 = arith.addf %3, %5 : vector<8x128xf32>
    %cst_5 = arith.constant 0.000000e+00 : f32
    %7 = vector.broadcast %cst_5 : f32 to vector<8x128xf32>
    %8 = arith.maximumf %6, %7 : vector<8x128xf32>
    %9 = arith.truncf %8 : vector<8x128xf32> to vector<8x128xbf16>
    %c0_6 = arith.constant 0 : index
    %c0_7 = arith.constant 0 : index
    %10 = vector.load %arg4[%c0_6, %c0_7] : memref<128x128xbf16, #tpu.memory_space<vmem>>, vector<128x128xbf16>
    %cst_8 = arith.constant dense<0.000000e+00> : vector<8x128xf32>
    %11 = tpu.matmul %9, %10, %cst_8 {dimension_numbers = #tpu.dot_dimension_numbers<[1], [0], [0], [1], [0, 0, 1, 1], [], []>} : vector<8x128xbf16>, vector<128x128xbf16>, vector<8x128xf32> -> vector<8x128xf32>
    %12 = arith.addf %0, %11 : vector<8x128xf32>
    %c0_9 = arith.constant 0 : index
    %c0_10 = arith.constant 0 : index
    %13 = vector.load %arg5[%c0_9, %c0_10] : memref<8x128xf32, #tpu.memory_space<vmem>>, vector<8x128xf32>
    tpu.vector_store %arg5[%c0_9, %c0_10], %12 {strides = array<i32>} : memref<8x128xf32, #tpu.memory_space<vmem>>, vector<8x128xf32>,
    return
  }
  func.func @transform_0(%arg0: i32) -> (i32, i32) {
    %c0_i32 = arith.constant 0 : i32
    %c0_i32_0 = arith.constant 0 : i32
    return %arg0, %c0_i32 : i32, i32
  }
  func.func @transform_1(%arg0: i32) -> (i32, i32) {
    %c0_i32 = arith.constant 0 : i32
    %c0_i32_0 = arith.constant 0 : i32
    %c0_i32_1 = arith.constant 0 : i32
    return %c0_i32, %c0_i32_0 : i32, i32
  }
  func.func @transform_2(%arg0: i32) -> (i32, i32) {
    %c0_i32 = arith.constant 0 : i32
    %c0_i32_0 = arith.constant 0 : i32
    %c0_i32_1 = arith.constant 0 : i32
    return %c0_i32, %c0_i32_0 : i32, i32
  }
  func.func @transform_3(%arg0: i32) -> (i32, i32) {
    %c0_i32 = arith.constant 0 : i32
    %c0_i32_0 = arith.constant 0 : i32
    %c0_i32_1 = arith.constant 0 : i32
    return %c0_i32, %c0_i32_0 : i32, i32
  }
  func.func @transform_4(%arg0: i32) -> (i32, i32) {
    %c0_i32 = arith.constant 0 : i32
    %c0_i32_0 = arith.constant 0 : i32
    return %arg0, %c0_i32 : i32, i32
  }
}

</mosaic_0001>

<bundles_post_ra>
// kernel: tpu_custom_call.1
= control target key start
LH: loop header
LB: loop body
LE: loop exit
PB: predicated region body
PF: predicated region fallthrough
CT: control target
= control target key end

     0   :  { %9 = vsyncpa [#allocation3], 0  ;;  %s480_s0 = inlined_call_operand.hbm [shape: f32[8,128], index: 0, kind: input, shape index: {}]   ;;  %s481_s1 = inlined_call_operand.hbm [shape: bf16[128,128], index: 1, kind: input, shape index: {}]   ;;  %s482_s2 = inlined_call_operand.vmem [shape: f32[1,128], index: 2, kind: input, shape index: {}]   ;;  %s483_s3 = inlined_call_operand.hbm [shape: bf16[128,128], index: 3, kind: input, shape index: {}]   ;;  %s484_s4 = inlined_call_operand.hbm [shape: f32[8,128], index: 4, kind: output, shape index: {}]  }
   0x1   :  { %10 = vsyncpa [#allocation6], 0  ;;  %s27_s17 = sshll.u32 %s481_s1, 4  ;;  %s28_s17 = int_to_ptr.hbm [resolvable:$true] %s27_s17 }
   0x2   :  { %11 = vsyncpa [#allocation4], 0  ;;  %s434_s18 = smov [#allocation5]   ;;  %s17_s22 = sshll.u32 %s480_s0, 4  ;;  %s18_s22 = int_to_ptr.hbm [resolvable:$true] %s17_s22 }
   0x3   :  { %s29_s19 = sshll.u32 %s434_s18, 4  ;;  %s435_s23 = smov 64   ;;  %s30_s19 = int_to_ptr.vmem [resolvable:$true] %s29_s19 }
   0x4   :  { %s436_s24 = smov 4   ;;  %s437_s25 = smov [#allocation2]  }
   0x5   :  { %35 = dma.hbm_to_vmem [thread:$0]  %s28_s17, 1024, %s30_s19, [#allocation6], %s435_s23, %s435_s23, %s436_s24  }
   0x6   :  { %s19_s26 = sshll.u32 %s437_s25, 4  ;;  %s42_s29 = sshll.u32 %s483_s3, 4  ;;  %s20_s26 = int_to_ptr.vmem [resolvable:$true] %s19_s26  ;;  %s43_s29 = int_to_ptr.hbm [resolvable:$true] %s42_s29 }
   0x7   :  { %22 = dma.hbm_to_vmem [thread:$0]  %s18_s22, 128, %s20_s26, [#allocation3]  }
   0x8   :  { %s438_s1 = smov [#allocation7]  }
   0x9   :  { %s44_s30 = sshll.u32 %s438_s1, 4  ;;  %s45_s30 = int_to_ptr.vmem [resolvable:$true] %s44_s30 }
   0xa   :  { %50 = dma.hbm_to_vmem [thread:$0]  %s43_s29, 1024, %s45_s30, [#allocation6], %s435_s23, %s435_s23, %s436_s24  }
   0xb   :  { %428 = dma.done.wait [#allocation3], 128  }
   0xc   :  { %429 = vsyncadd [#allocation3], 4294967168 }
   0xd   :  { %430 = dma.done.wait [#allocation6], 2048  }
   0xe   :  { %431 = vsyncadd [#allocation6], 4294965248  ;;  %v316_v0 = vld [vmem:[#allocation5 + $0x38] sm:$0xff]  ;;  %v315_v1 = vld [vmem:[#allocation5 + $0x30] sm:$0xff]  ;;  %s439_s5 = smov [#allocation8]   ;;  %s234_s9 = sshll.u32 %s484_s4, 4  ;;  %s235_s9 = int_to_ptr.hbm [resolvable:$true] %s234_s9 }
   0xf   :  { %133 = vmatpush.bf16.msra.mxu0 %v316_v0  ;;  %v324_v2 = vld [vmem:[#allocation7 + $0x38] sm:$0xff]  ;;  %v323_v3 = vld [vmem:[#allocation7 + $0x30] sm:$0xff]  ;;  %v314_v4 = vld [vmem:[#allocation5 + $0x28] sm:$0xff]  ;;  %s232_s6 = sshll.u32 %s439_s5, 4  ;;  %s233_s6 = int_to_ptr.vmem [resolvable:$true] %s232_s6 }
  0x10   :  { %212 = vmatpush.bf16.msra.mxu1 %v324_v2  ;;  %v322_v5 = vld [vmem:[#allocation7 + $0x28] sm:$0xff]  ;;  %v313_v6 = vld [vmem:[#allocation5 + $0x20] sm:$0xff]  ;;  %v312_v8 = vld [vmem:[#allocation5 + $0x18] sm:$0xff] }
  0x11   :  { %v321_v7 = vld [vmem:[#allocation7 + $0x20] sm:$0xff]  ;;  %v320_v9 = vld [vmem:[#allocation7 + $0x18] sm:$0xff]  ;;  %v311_v10 = vld [vmem:[#allocation5 + $0x10] sm:$0xff] }
  0x12   :  { %v319_v11 = vld [vmem:[#allocation7 + $0x10] sm:$0xff]  ;;  %v310_v12 = vld [vmem:[#allocation5 + $0x8] sm:$0xff]  ;;  %v309_v13 = vld [vmem:[#allocation5] sm:$0xff] }
  0x13   :  { %134 = vmatpush.bf16.msra.mxu0 %v315_v1  ;;  %v63_v14 = vld [vmem:[#allocation2] sm:$0xff]  ;;  %v318_v16 = vld [vmem:[#allocation7 + $0x8] sm:$0xff]  ;;  %v317_v17 = vld [vmem:[#allocation7] sm:$0xff] }
  0x14   :  { %213 = vmatpush.bf16.msra.mxu1 %v323_v3  ;;  %v64_v15 = vpack.c.bf16 %v63_v14, %v63_v14  ;;  %v331_v18 = vld [vmem:[%s482_s2] ss:$0 sm:$0xff] }
  0x17   :  { %135 = vmatpush.bf16.msra.mxu0 %v314_v4 }
  0x18   :  { %214 = vmatpush.bf16.msra.mxu1 %v322_v5 }
  0x1b   :  { %136 = vmatpush.bf16.msra.mxu0 %v313_v6 }
  0x1c   :  { %215 = vmatpush.bf16.msra.mxu1 %v321_v7 }
  0x1f   :  { %137 = vmatpush.bf16.msra.mxu0 %v312_v8 }
  0x20   :  { %216 = vmatpush.bf16.msra.mxu1 %v320_v9 }
  0x23   :  { %138 = vmatpush.bf16.msra.mxu0 %v311_v10 }
  0x24   :  { %217 = vmatpush.bf16.msra.mxu1 %v319_v11 }
  0x27   :  { %139 = vmatpush.bf16.msra.mxu0 %v310_v12 }
  0x28   :  { %218 = vmatpush.bf16.msra.mxu1 %v318_v16 }
  0x2b   :  { %140 = vmatpush.bf16.msra.mxu0 %v309_v13 }
  0x2c   :  { %219 = vmatpush.bf16.msra.mxu1 %v317_v17 }
  0x2e   :  { %141 = vmatmul.bf16.vlgmr.msra.gmra.mxu0 %v64_v15 }
  0xab   :  { %v142_v19 = vpop.f32.mrf.mxu0 }
  0xac   :  { %v143_v20 = vadd.f32 %v331_v18, %v142_v19 }
  0xae   :  { %v146_v21 = vmax.f32 %v143_v20, 0.0 }
  0xb0   :  { %v147_v22 = vpack.c.bf16 %v146_v21, %v146_v21 }
  0xb2   :  { %220 = vmatmul.bf16.vlgmr.msra.gmra.mxu1 %v147_v22 }
  0xb3   :  { %v144_v23 = vpop.f32.mrf.mxu0 }
 0x12f   :  { %v221_v24 = vpop.f32.mrf.mxu1 }
 0x130   :  { %v225_v25 = vadd.f32 %v221_v24, %v63_v14 }
 0x132   :  { %226 = vst [vmem:[#allocation8] sm:$0xff] %v225_v25 }
 0x133   :  { %237 = dma.vmem_to_hbm [thread:$0]  %s233_s6, 128, %s235_s9, [#allocation4]  }
 0x137   :  { %v223_v26 = vpop.f32.mrf.mxu1 }
 0x138   :  { %432 = dma.done.wait [#allocation4], 128  }
 0x139   :  { %433 = vsyncadd [#allocation4], 4294967168 }
 0x13a   :  { %242 = vsyncpa [#allocation3], 1 }
 0x13b   :  { %243 = vsyncpa [#allocation6], 1 }
 0x13c   :  { %244 = vsyncpa [#allocation4], 1 }

// kernel: tpu_custom_call.1
= control target key start
LH: loop header
LB: loop body
LE: loop exit
PB: predicated region body
PF: predicated region fallthrough
CT: control target
= control target key end

     0   :  { %9 = vsyncpa [#allocation3], 0  ;;  %s480_s0 = inlined_call_operand.hbm [shape: f32[8,128], index: 0, kind: input, shape index: {}]   ;;  %s481_s1 = inlined_call_operand.hbm [shape: bf16[128,128], index: 1, kind: input, shape index: {}]   ;;  %s482_s2 = inlined_call_operand.vmem [shape: f32[1,128], index: 2, kind: input, shape index: {}]   ;;  %s483_s3 = inlined_call_operand.hbm [shape: bf16[128,128], index: 3, kind: input, shape index: {}]   ;;  %s484_s4 = inlined_call_operand.hbm [shape: f32[8,128], index: 4, kind: output, shape index: {}]  }
   0x1   :  { %10 = vsyncpa [#allocation6], 0  ;;  %s27_s17 = sshll.u32 %s481_s1, 4  ;;  %s28_s17 = int_to_ptr.hbm [resolvable:$true] %s27_s17 }
   0x2   :  { %11 = vsyncpa [#allocation4], 0  ;;  %s434_s18 = smov [#allocation5]   ;;  %s17_s22 = sshll.u32 %s480_s0, 4  ;;  %s18_s22 = int_to_ptr.hbm [resolvable:$true] %s17_s22 }
   0x3   :  { %s29_s19 = sshll.u32 %s434_s18, 4  ;;  %s435_s23 = smov 64   ;;  %s30_s19 = int_to_ptr.vmem [resolvable:$true] %s29_s19 }
   0x4   :  { %s436_s24 = smov 4   ;;  %s437_s25 = smov [#allocation2]  }
   0x5   :  { %35 = dma.hbm_to_vmem [thread:$0]  %s28_s17, 1024, %s30_s19, [#allocation6], %s435_s23, %s435_s23, %s436_s24  }
   0x6   :  { %s19_s26 = sshll.u32 %s437_s25, 4  ;;  %s42_s29 = sshll.u32 %s483_s3, 4  ;;  %s20_s26 = int_to_ptr.vmem [resolvable:$true] %s19_s26  ;;  %s43_s29 = int_to_ptr.hbm [resolvable:$true] %s42_s29 }
   0x7   :  { %22 = dma.hbm_to_vmem [thread:$0]  %s18_s22, 128, %s20_s26, [#allocation3]  }
   0x8   :  { %s438_s1 = smov [#allocation7]  }
   0x9   :  { %s44_s30 = sshll.u32 %s438_s1, 4  ;;  %s45_s30 = int_to_ptr.vmem [resolvable:$true] %s44_s30 }
   0xa   :  { %50 = dma.hbm_to_vmem [thread:$0]  %s43_s29, 1024, %s45_s30, [#allocation6], %s435_s23, %s435_s23, %s436_s24  }
   0xb   :  { %428 = dma.done.wait [#allocation3], 128  }
   0xc   :  { %429 = vsyncadd [#allocation3], 4294967168 }
   0xd   :  { %430 = dma.done.wait [#allocation6], 2048  }
   0xe   :  { %431 = vsyncadd [#allocation6], 4294965248  ;;  %v316_v0 = vld [vmem:[#allocation5 + $0x38] sm:$0xff]  ;;  %v315_v1 = vld [vmem:[#allocation5 + $0x30] sm:$0xff]  ;;  %s439_s5 = smov [#allocation8]   ;;  %s234_s9 = sshll.u32 %s484_s4, 4  ;;  %s235_s9 = int_to_ptr.hbm [resolvable:$true] %s234_s9 }
   0xf   :  { %133 = vmatpush.bf16.msra.mxu0 %v316_v0  ;;  %v324_v2 = vld [vmem:[#allocation7 + $0x38] sm:$0xff]  ;;  %v323_v3 = vld [vmem:[#allocation7 + $0x30] sm:$0xff]  ;;  %v314_v4 = vld [vmem:[#allocation5 + $0x28] sm:$0xff]  ;;  %s232_s6 = sshll.u32 %s439_s5, 4  ;;  %s233_s6 = int_to_ptr.vmem [resolvable:$true] %s232_s6 }
  0x10   :  { %212 = vmatpush.bf16.msra.mxu1 %v324_v2  ;;  %v322_v5 = vld [vmem:[#allocation7 + $0x28] sm:$0xff]  ;;  %v313_v6 = vld [vmem:[#allocation5 + $0x20] sm:$0xff]  ;;  %v312_v8 = vld [vmem:[#allocation5 + $0x18] sm:$0xff] }
  0x11   :  { %v321_v7 = vld [vmem:[#allocation7 + $0x20] sm:$0xff]  ;;  %v320_v9 = vld [vmem:[#allocation7 + $0x18] sm:$0xff]  ;;  %v311_v10 = vld [vmem:[#allocation5 + $0x10] sm:$0xff] }
  0x12   :  { %v319_v11 = vld [vmem:[#allocation7 + $0x10] sm:$0xff]  ;;  %v310_v12 = vld [vmem:[#allocation5 + $0x8] sm:$0xff]  ;;  %v309_v13 = vld [vmem:[#allocation5] sm:$0xff] }
  0x13   :  { %134 = vmatpush.bf16.msra.mxu0 %v315_v1  ;;  %v63_v14 = vld [vmem:[#allocation2] sm:$0xff]  ;;  %v318_v16 = vld [vmem:[#allocation7 + $0x8] sm:$0xff]  ;;  %v317_v17 = vld [vmem:[#allocation7] sm:$0xff] }
  0x14   :  { %213 = vmatpush.bf16.msra.mxu1 %v323_v3  ;;  %v64_v15 = vpack.c.bf16 %v63_v14, %v63_v14  ;;  %v331_v18 = vld [vmem:[%s482_s2] ss:$0 sm:$0xff] }
  0x17   :  { %135 = vmatpush.bf16.msra.mxu0 %v314_v4 }
  0x18   :  { %214 = vmatpush.bf16.msra.mxu1 %v322_v5 }
  0x1b   :  { %136 = vmatpush.bf16.msra.mxu0 %v313_v6 }
  0x1c   :  { %215 = vmatpush.bf16.msra.mxu1 %v321_v7 }
  0x1f   :  { %137 = vmatpush.bf16.msra.mxu0 %v312_v8 }
  0x20   :  { %216 = vmatpush.bf16.msra.mxu1 %v320_v9 }
  0x23   :  { %138 = vmatpush.bf16.msra.mxu0 %v311_v10 }
  0x24   :  { %217 = vmatpush.bf16.msra.mxu1 %v319_v11 }
  0x27   :  { %139 = vmatpush.bf16.msra.mxu0 %v310_v12 }
  0x28   :  { %218 = vmatpush.bf16.msra.mxu1 %v318_v16 }
  0x2b   :  { %140 = vmatpush.bf16.msra.mxu0 %v309_v13 }
  0x2c   :  { %219 = vmatpush.bf16.msra.mxu1 %v317_v17 }
  0x2e   :  { %141 = vmatmul.bf16.vlgmr.msra.gmra.mxu0 %v64_v15 }
  0xab   :  { %v142_v19 = vpop.f32.mrf.mxu0 }
  0xac   :  { %v143_v20 = vadd.f32 %v331_v18, %v142_v19 }
  0xae   :  { %v146_v21 = vmax.f32 %v143_v20, 0.0 }
  0xb0   :  { %v147_v22 = vpack.c.bf16 %v146_v21, %v146_v21 }
  0xb2   :  { %220 = vmatmul.bf16.vlgmr.msra.gmra.mxu1 %v147_v22 }
  0xb3   :  { %v144_v23 = vpop.f32.mrf.mxu0 }
 0x12f   :  { %v221_v24 = vpop.f32.mrf.mxu1 }
 0x130   :  { %v225_v25 = vadd.f32 %v221_v24, %v63_v14 }
 0x132   :  { %226 = vst [vmem:[#allocation8] sm:$0xff] %v225_v25 }
 0x133   :  { %237 = dma.vmem_to_hbm [thread:$0]  %s233_s6, 128, %s235_s9, [#allocation4]  }
 0x137   :  { %v223_v26 = vpop.f32.mrf.mxu1 }
 0x138   :  { %432 = dma.done.wait [#allocation4], 128  }
 0x139   :  { %433 = vsyncadd [#allocation4], 4294967168 }
 0x13a   :  { %242 = vsyncpa [#allocation3], 1 }
 0x13b   :  { %243 = vsyncpa [#allocation6], 1 }
 0x13c   :  { %244 = vsyncpa [#allocation4], 1 }

</bundles_post_ra>
